<compile_context>
chip_gen: v7x
topology: tpu7x:2x2x1
jax: 0.10.0
libtpu: 0.0.40
codegen_flags: <defaults>
</compile_context>

<pallas_src>
import jax
import jax.numpy as jnp
from jax.experimental import pallas as pl
from jax.experimental.pallas import tpu as pltpu


_LANES = 128                     # vreg lane width — last dim of the lane-dense slab
_TILE_TARGET_BYTES = 512 * 1024  # ~512 KiB per block: (in + out) x double-buffer ~ 2 MiB
_VMEM_LIMIT_BYTES = 16 * 1024 * 1024  # explicit, well under v7x's 32 MiB scoped default


def _sublane_multiple(dtype):
    """Sublane packing granularity: 8 rows (32-bit), 16 (16-bit), 32 (8-bit)."""
    return max(8, 32 // jnp.dtype(dtype).itemsize)


# ----------------------------------------------------------------------------
# Pallas kernel: tiled identity copy through VMEM (pure load/store path).
# ----------------------------------------------------------------------------
def _copy_kernel(x_ref, o_ref):
    o_ref[...] = x_ref[...]


@jax.jit
def vmem_copy(x):
    """Materialize a fresh copy of `x`: one HBM read + one HBM write, tiled.

    Lane-dense [rows, 128] layout when size % 128 == 0 (reshape is a free
    contiguous bitcast under jit — no pad / slice HBM passes); otherwise a
    single full-extent block of the original shape.
    """
    n = x.size
    if n == 0:
        return x
    dtype = jnp.dtype(x.dtype)

    if n % _LANES == 0:
        rows = n // _LANES
        x2 = x.reshape(rows, _LANES)
        sub = _sublane_multiple(dtype)
        # ~512 KiB per block, rounded down to a sublane multiple.
        max_rows = max(sub, (_TILE_TARGET_BYTES // (_LANES * dtype.itemsize)) // sub * sub)
        tile_rows = rows if rows <= max_rows else max_rows
        grid = (pl.cdiv(rows, tile_rows),)
        out = pl.pallas_call(
            _copy_kernel,
            out_shape=jax.ShapeDtypeStruct((rows, _LANES), dtype),
            grid=grid,
            in_specs=[pl.BlockSpec((tile_rows, _LANES), lambda i: (i, 0))],
            out_specs=pl.BlockSpec((tile_rows, _LANES), lambda i: (i, 0)),
            compiler_params=pltpu.CompilerParams(
                dimension_semantics=("parallel",),
                vmem_limit_bytes=_VMEM_LIMIT_BYTES,
            ),
        )(x2)
        return out.reshape(x.shape)

    # Fallback: size not a multiple of 128 — avoid pad/slice HBM passes by
    # using the whole array as one full-extent block (allowed by the (8,128)
    # rule when the block equals the full array dims).
    shape2 = x.shape if x.ndim >= 2 else (1, n)
    x2 = x.reshape(shape2)
    nd = len(shape2)
    out = pl.pallas_call(
        _copy_kernel,
        out_shape=jax.ShapeDtypeStruct(shape2, dtype),
        grid=(1,),
        in_specs=[pl.BlockSpec(shape2, lambda i: (0,) * nd)],
        out_specs=pl.BlockSpec(shape2, lambda i: (0,) * nd),
        compiler_params=pltpu.CompilerParams(
            dimension_semantics=("arbitrary",),
            vmem_limit_bytes=_VMEM_LIMIT_BYTES,
        ),
    )(x2)
    return out.reshape(x.shape)


def stage_decoder_inputs(feat, out_enc, *, materialize=False):
    """Hand (feat, out_enc) onward to a concrete decoder.

    BaseDecoder performs no compute on these tensors, so the optimal staging
    is no staging at all: by default the inputs are returned untouched (zero
    HBM traffic) and the subclass kernel reads them in place.  Set
    `materialize=True` only if a subclass needs physically fresh buffers;
    that path runs the tiled, pipelined VMEM copy above.
    """
    if not materialize:
        return feat, out_enc
    return vmem_copy(feat), vmem_copy(out_enc)


# ----------------------------------------------------------------------------
# BaseDecoder: exact forward-dispatch semantics of the PyTorch module.
# No kernels are launched here — both branches are abstract.
# ----------------------------------------------------------------------------
class BaseDecoder:
    def __init__(self, **kwargs):
        # The PyTorch __init__ defines no parameters.
        pass

    # TODO(synk): forward_train / forward_test are abstract in the reference
    # module (raise NotImplementedError); there is no compute to translate.
    def forward_train(self, feat, out_enc, targets, valid_ratios):
        raise NotImplementedError

    def forward_test(self, feat, out_enc, valid_ratios):
        raise NotImplementedError

    def forward(self, feat, out_enc, label=None, valid_ratios=None,
                train_mode=True):
        self.train_mode = train_mode
        if train_mode:
            return self.forward_train(feat, out_enc, label, valid_ratios)
        return self.forward_test(feat, out_enc, valid_ratios)

    __call__ = forward


if __name__ == "__main__":
    key = jax.random.PRNGKey(0)
    k1, k2, k3 = jax.random.split(key, 3)

    B, C, H, W = 2, 4, 16, 16     # feat    [B, C, H, W]  (NCHW)
    T, D = 8, 32                  # out_enc [B, T, D]

    feat = jax.random.normal(k1, (B, C, H, W), dtype=jnp.float32)
    out_enc = jax.random.normal(k2, (B, T, D), dtype=jnp.float32)

    # Default staging path: zero-copy pass-through (review item 1 — the
    # identity path launches no kernel and moves no HBM bytes).
    f0, e0 = stage_decoder_inputs(feat, out_enc)
    assert f0 is feat and e0 is out_enc

    # Materialized path: run the tiled Pallas copy kernel once and block.
    f1, e1 = stage_decoder_inputs(feat, out_enc, materialize=True)
    f1, e1 = jax.block_until_ready((f1, e1))
    assert f1.dtype == feat.dtype and e1.dtype == out_enc.dtype
    assert jnp.array_equal(f1, feat) and jnp.array_equal(e1, out_enc)

    # Exercise multi-step tiling (grid > 1 with a masked partial last block),
    # bf16 sublane-aware tile selection, and the odd-size full-block fallback.
    big = jax.random.normal(k3, (9, 128, 128), dtype=jnp.float32)    # 1152 rows -> 2 grid steps
    big_bf16 = big.astype(jnp.bfloat16)                              # half the HBM bytes
    odd = jnp.arange(2 * 7 * 9, dtype=jnp.float32).reshape(2, 7, 9)  # size % 128 != 0
    for t in (big, big_bf16, odd):
        y = jax.block_until_ready(vmem_copy(t))
        assert y.dtype == t.dtype and jnp.array_equal(y, t)

    # Dispatch semantics match the PyTorch base class: both branches raise.
    dec = BaseDecoder()
    raised = []
    for mode in (True, False):
        try:
            dec(feat, out_enc, label=None, valid_ratios=None, train_mode=mode)
        except NotImplementedError:
            raised.append(mode)
    assert raised == [True, False] and dec.train_mode is False

    print("KERNEL_OK")
</pallas_src>

<mosaic_0001>
module attributes {stable_mosaic.version = 11 : i64} {
  func.func @_copy_kernel(%arg0: i32, %arg1: memref<16x128xf32, #tpu.memory_space<vmem>>, %arg2: memref<16x128xf32, #tpu.memory_space<vmem>>) attributes {dimension_semantics = [#tpu.dimension_semantics<parallel>], iteration_bounds = array<i64: 1>, scalar_prefetch = 0 : i64, scratch_operands = 0 : i64, tpu.core_type = #tpu.core_type<tc>, window_params = [{transform_indices = @transform_0, window_bounds = array<i64: 16, 128>}, {transform_indices = @transform_1, window_bounds = array<i64: 16, 128>}]} {
    %c0 = arith.constant 0 : index
    %c0_0 = arith.constant 0 : index
    %0 = vector.load %arg1[%c0, %c0_0] : memref<16x128xf32, #tpu.memory_space<vmem>>, vector<16x128xf32>
    %c0_1 = arith.constant 0 : index
    %c0_2 = arith.constant 0 : index
    %1 = vector.load %arg2[%c0_1, %c0_2] : memref<16x128xf32, #tpu.memory_space<vmem>>, vector<16x128xf32>
    tpu.vector_store %arg2[%c0_1, %c0_2], %0 {strides = array<i32>} : memref<16x128xf32, #tpu.memory_space<vmem>>, vector<16x128xf32>,
    return
  }
  func.func @transform_0(%arg0: i32) -> (i32, i32) {
    %c0_i32 = arith.constant 0 : i32
    %c0_i32_0 = arith.constant 0 : i32
    return %arg0, %c0_i32 : i32, i32
  }
  func.func @transform_1(%arg0: i32) -> (i32, i32) {
    %c0_i32 = arith.constant 0 : i32
    %c0_i32_0 = arith.constant 0 : i32
    return %arg0, %c0_i32 : i32, i32
  }
}

</mosaic_0001>

<bundles_post_ra>
// kernel: vmem_copy.1
= control target key start
LH: loop header
LB: loop body
LE: loop exit
PB: predicated region body
PF: predicated region fallthrough
CT: control target
= control target key end

     0   :  { %s38_s0 = inlined_call_operand.vmem [shape: f32[16,128], index: 0, kind: input, shape index: {}]   ;;  %s39_s1 = inlined_call_operand.vmem [shape: f32[16,128], index: 1, kind: output, shape index: {}]  }
   0x1   :  { %v8_v0 = vld [vmem:[%s38_s0] sm:$0xff]  ;;  %v9_v1 = vld [vmem:[%s38_s0 + $0x8] sm:$0xff] }
   0x2   :  { %10 = vst [vmem:[%s39_s1] sm:$0xff] %v8_v0  ;;  %11 = vst [vmem:[%s39_s1 + $0x8] sm:$0xff] %v9_v1 }

</bundles_post_ra>
